<compile_context>
chip_gen: v7x
topology: tpu7x:2x2x1
jax: 0.10.0
libtpu: 0.0.40
codegen_flags: <defaults>
</compile_context>

<pallas_src>
import functools

import jax
import jax.numpy as jnp
from jax import lax
from jax.experimental import pallas as pl
from jax.experimental.pallas import tpu as pltpu


def _round_up(x: int, m: int) -> int:
    return ((x + m - 1) // m) * m


def _sublane_multiple(dtype) -> int:
    """Minimum row-tile multiple for the dtype's sublane packing."""
    itemsize = jnp.dtype(dtype).itemsize
    return {4: 8, 2: 16, 1: 32}.get(itemsize, 8)


def _chip_vmem_defaults():
    """(streaming budget bytes, vmem_limit cap bytes) from the chip's VMEM."""
    try:
        cap = int(pltpu.get_tpu_info().vmem_capacity_bytes)
    except Exception:
        cap = 64 * 1024 * 1024  # conservative (v7x-sized) fallback
    if cap >= 100 * 1024 * 1024:          # v5e / v6e: 128 MiB physical VMEM
        return 32 * 1024 * 1024, 100 * 1024 * 1024
    return 16 * 1024 * 1024, 48 * 1024 * 1024   # v7x: 64 MiB physical VMEM


def _strategic_reg_kernel(x_ref, out_ref, acc_ref, *,
                          inv_count, tile_b, tile_d,
                          rows, cols, row_ragged, col_ragged):
    """Grid-accumulated mean reduction.

    Grid: (row_tile, col_tile) — both sequential reduction axes accumulating
    into the (8, tile_d) VMEM scratch.  Only boundary tiles (last row / last
    col tile when that axis is ragged) run the masked path.
    """
    i = pl.program_id(0)
    j = pl.program_id(1)
    ni = pl.num_programs(0)
    nj = pl.num_programs(1)

    @pl.when((i == 0) & (j == 0))
    def _init():
        acc_ref[...] = jnp.zeros_like(acc_ref)

    def _accumulate(x):
        # (tile_b, tile_d) -> (tile_b//8, 8, tile_d) splits the leading dim
        # at sublane granularity (free reshape); axis-0 sum is pure VPU adds
        # — one vadd per loaded vreg, no XLU in the hot loop.
        acc_ref[...] += x.reshape(tile_b // 8, 8, tile_d).sum(axis=0)

    if row_ragged or col_ragged:
        is_boundary = None
        if row_ragged:
            is_boundary = (i == ni - 1)
        if col_ragged:
            cb = (j == nj - 1)
            is_boundary = cb if is_boundary is None else (is_boundary | cb)

        @pl.when(jnp.logical_not(is_boundary))
        def _interior():
            _accumulate(x_ref[...].astype(jnp.float32))

        @pl.when(is_boundary)
        def _boundary():
            x = x_ref[...].astype(jnp.float32)
            if row_ragged:
                rmask = (i * tile_b + lax.broadcasted_iota(
                    jnp.int32, (tile_b, 1), 0)) < rows
                x = jnp.where(rmask, x, 0.0)
            if col_ragged:
                cmask = (j * tile_d + lax.broadcasted_iota(
                    jnp.int32, (1, tile_d), 1)) < cols
                x = jnp.where(cmask, x, 0.0)
            _accumulate(x)
    else:
        _accumulate(x_ref[...].astype(jnp.float32))

    @pl.when((i == ni - 1) & (j == nj - 1))
    def _finalize():
        # Single cross-sublane/lane reduce, done once at the very end.
        val = jnp.sum(acc_ref[...]) * inv_count
        out_ref[...] = jnp.broadcast_to(val, (8, 128)).astype(jnp.float32)


def strategic_regularization(x: jax.Array, *,
                             vmem_budget_bytes: int | None = None,
                             tile_d_cap: int = 8192) -> jax.Array:
    """Base-class strategic regularization: returns a (1, 1) float32 tensor.

    x: strategic features of any rank; flattened to [B, D] internally.
    vmem_budget_bytes: streaming working-set budget (double-buffered input
        block + f32 upcast temp); chip-aware default when None.
    tile_d_cap: max column-tile width (lane-aligned).
    """
    # Flatten to 2-D [B, D].
    if x.ndim == 0:
        x2d = x.reshape(1, 1)
    elif x.ndim == 1:
        x2d = x.reshape(1, x.shape[0])
    else:
        x2d = x.reshape(x.shape[0], -1)
    B, D = x2d.shape
    itemsize = jnp.dtype(x2d.dtype).itemsize
    sublane = _sublane_multiple(x2d.dtype)

    default_budget, vmem_limit_cap = _chip_vmem_defaults()
    if vmem_budget_bytes is None:
        vmem_budget_bytes = default_budget

    # Tile sizes: lane-aligned column tile, sublane-packed row tile sized so
    # that (double-buffered input block + f32 upcast temp) fits the budget.
    D_aligned = _round_up(D, 128)
    B_aligned = _round_up(B, sublane)
    tile_d = min(D_aligned, max(128, _round_up(tile_d_cap, 128)))

    bytes_per_elem = 2 * itemsize + (4 if itemsize < 4 else 0)
    rows_budget = max(sublane, vmem_budget_bytes // (bytes_per_elem * tile_d))
    tile_b = max(sublane, min(B_aligned, (rows_budget // sublane) * sublane))

    # Grid over the ORIGINAL (unpadded) extents; edge blocks are ragged and
    # masked in-kernel.  No jnp.pad (no extra full-HBM round trip).
    nb = pl.cdiv(B, tile_b)
    nd = pl.cdiv(D, tile_d)
    row_ragged = (nb * tile_b) != B
    col_ragged = (nd * tile_d) != D

    inv_count = 1.0 / float(B * D)

    kernel = functools.partial(
        _strategic_reg_kernel,
        inv_count=inv_count, tile_b=tile_b, tile_d=tile_d,
        rows=B, cols=D, row_ragged=row_ragged, col_ragged=col_ragged)

    block_bytes = tile_b * tile_d * itemsize
    upcast_bytes = tile_b * tile_d * 4 if itemsize < 4 else 0
    acc_bytes = 8 * tile_d * 4
    need = 2 * block_bytes + upcast_bytes + acc_bytes + 8 * 128 * 4
    vmem_limit = min(vmem_limit_cap,
                     max(32 * 1024 * 1024, int(1.25 * need) + (1 << 20)))

    out = pl.pallas_call(
        kernel,
        out_shape=jax.ShapeDtypeStruct((8, 128), jnp.float32),
        grid_spec=pltpu.PrefetchScalarGridSpec(
            num_scalar_prefetch=0,
            grid=(nb, nd),
            in_specs=[pl.BlockSpec((tile_b, tile_d), lambda i, j: (i, j))],
            out_specs=pl.BlockSpec((8, 128), lambda i, j: (0, 0)),
            scratch_shapes=[pltpu.VMEM((8, tile_d), jnp.float32)],
        ),
        compiler_params=pltpu.CompilerParams(
            dimension_semantics=("arbitrary", "arbitrary"),
            vmem_limit_bytes=vmem_limit,
        ),
        cost_estimate=pl.CostEstimate(
            flops=B * D,
            transcendentals=0,
            bytes_accessed=B * D * itemsize + 8 * 128 * 4),
    )(x2d)

    return out[0, 0].reshape(1, 1)


class StrategicRegularizationPallas:
    """Mirror of the abstract PyTorch base class.

    `forward` raises NotImplementedError (exact base-class semantics);
    `default_forward` is the Pallas-backed (1,1) reduction used as the
    shared hot path by concrete subclasses.
    """

    def forward(self, *args, **kwargs):
        raise NotImplementedError()

    def default_forward(self, x: jax.Array) -> jax.Array:
        return strategic_regularization(x)


if __name__ == "__main__":
    key = jax.random.PRNGKey(0)
    k1, k2, k3, k4 = jax.random.split(key, 4)

    module = StrategicRegularizationPallas()

    # Case 1: NCHW-style strategic features (flattened to [2, 1024] inside).
    x1 = jax.random.normal(k1, (2, 4, 16, 16), dtype=jnp.float32)
    out1 = jax.block_until_ready(module.default_forward(x1))
    ref1 = jnp.mean(x1).reshape(1, 1)
    assert out1.shape == (1, 1) and out1.dtype == jnp.float32, (out1.shape, out1.dtype)
    assert jnp.allclose(out1, ref1, atol=1e-5, rtol=1e-5), (out1, ref1)

    # Case 2: ragged rows AND cols + tiny VMEM budget -> 2x2 grid with one
    # interior tile, one row-boundary, one col-boundary and one corner tile
    # (exercises the pl.when mask gating, no wrapper-side padding).
    x2 = jax.random.normal(k2, (20, 300), dtype=jnp.float32)
    out2 = jax.block_until_ready(
        strategic_regularization(x2, vmem_budget_bytes=16 * 8 * 256,
                                 tile_d_cap=256))
    ref2 = jnp.mean(x2).reshape(1, 1)
    assert jnp.allclose(out2, ref2, atol=1e-5, rtol=1e-5), (out2, ref2)

    # Case 3: bfloat16 input (16-row sublane packing) ragged on both axes;
    # checks the f32-upcast-aware tile sizing and masking for narrow dtypes.
    x3 = jax.random.normal(k3, (10, 130), dtype=jnp.float32).astype(jnp.bfloat16)
    out3 = jax.block_until_ready(module.default_forward(x3))
    ref3 = jnp.mean(x3.astype(jnp.float32)).reshape(1, 1)
    assert jnp.allclose(out3, ref3, atol=1e-4, rtol=1e-4), (out3, ref3)

    # Case 4: perfectly aligned multi-tile grid -> pure unmasked fast path.
    x4 = jax.random.normal(k4, (32, 512), dtype=jnp.float32)
    out4 = jax.block_until_ready(
        strategic_regularization(x4, vmem_budget_bytes=16 * 8 * 256,
                                 tile_d_cap=256))
    ref4 = jnp.mean(x4).reshape(1, 1)
    assert jnp.allclose(out4, ref4, atol=1e-5, rtol=1e-5), (out4, ref4)

    print("KERNEL_OK")
</pallas_src>

<mosaic_0001>
module attributes {stable_mosaic.version = 11 : i64} {
  func.func @_strategic_reg_kernel(%arg0: i32, %arg1: i32, %arg2: memref<8x1024xf32, #tpu.memory_space<vmem>>, %arg3: memref<8x128xf32, #tpu.memory_space<vmem>>, %arg4: memref<8x1024xf32, #tpu.memory_space<vmem>>) attributes {dimension_semantics = [#tpu.dimension_semantics<arbitrary>, #tpu.dimension_semantics<arbitrary>], iteration_bounds = array<i64: 1, 1>, scalar_prefetch = 0 : i64, scratch_operands = 1 : i64, tpu.core_type = #tpu.core_type<tc>, window_params = [{transform_indices = @transform_0, window_bounds = array<i64: 8, 1024>}, {pipeline_mode = #tpu.pipeline_mode<synchronous>, transform_indices = @transform_1, window_bounds = array<i64: 8, 128>}]} {
    %c0_i32 = arith.constant 0 : i32
    %0 = arith.cmpi eq, %arg0, %c0_i32 : i32
    %c0_i32_0 = arith.constant 0 : i32
    %1 = arith.cmpi eq, %arg1, %c0_i32_0 : i32
    %2 = arith.andi %0, %1 : i1
    %3 = arith.extui %2 : i1 to i32
    %c0_i32_1 = arith.constant 0 : i32
    %4 = arith.cmpi ne, %3, %c0_i32_1 : i32
    scf.if %4 {
      %cst = arith.constant 0.000000e+00 : f32
      %16 = vector.broadcast %cst : f32 to vector<8x1024xf32>
      %c0 = arith.constant 0 : index
      %c0_8 = arith.constant 0 : index
      %17 = vector.load %arg4[%c0, %c0_8] : memref<8x1024xf32, #tpu.memory_space<vmem>>, vector<8x1024xf32>
      tpu.vector_store %arg4[%c0, %c0_8], %16 {strides = array<i32>} : memref<8x1024xf32, #tpu.memory_space<vmem>>, vector<8x1024xf32>,
    } else {
    }
    %c0_i32_2 = arith.constant 0 : i32
    %5 = arith.cmpi eq, %arg0, %c0_i32_2 : i32
    %true = arith.constant true
    %6 = arith.xori %5, %true : i1
    %7 = arith.extui %6 : i1 to i32
    %c0_i32_3 = arith.constant 0 : i32
    %8 = arith.cmpi ne, %7, %c0_i32_3 : i32
    scf.if %8 {
      %c0 = arith.constant 0 : index
      %c0_8 = arith.constant 0 : index
      %16 = vector.load %arg2[%c0, %c0_8] : memref<8x1024xf32, #tpu.memory_space<vmem>>, vector<8x1024xf32>
      %c0_9 = arith.constant 0 : index
      %c0_10 = arith.constant 0 : index
      %17 = vector.load %arg4[%c0_9, %c0_10] : memref<8x1024xf32, #tpu.memory_space<vmem>>, vector<8x1024xf32>
      %18 = vector.shape_cast %16 : vector<8x1024xf32> to vector<1x8x1024xf32>
      %cst = arith.constant dense<0.000000e+00> : vector<8x1024xf32>
      %19 = vector.multi_reduction <add>, %18, %cst [0] : vector<1x8x1024xf32> to vector<8x1024xf32>
      %20 = arith.addf %17, %19 : vector<8x1024xf32>
      %c0_11 = arith.constant 0 : index
      %c0_12 = arith.constant 0 : index
      %21 = vector.load %arg4[%c0_11, %c0_12] : memref<8x1024xf32, #tpu.memory_space<vmem>>, vector<8x1024xf32>
      tpu.vector_store %arg4[%c0_11, %c0_12], %20 {strides = array<i32>} : memref<8x1024xf32, #tpu.memory_space<vmem>>, vector<8x1024xf32>,
    } else {
    }
    %9 = arith.extui %5 : i1 to i32
    %c0_i32_4 = arith.constant 0 : i32
    %10 = arith.cmpi ne, %9, %c0_i32_4 : i32
    scf.if %10 {
      %c0 = arith.constant 0 : index
      %c0_8 = arith.constant 0 : index
      %16 = vector.load %arg2[%c0, %c0_8] : memref<8x1024xf32, #tpu.memory_space<vmem>>, vector<8x1024xf32>
      %c8_i32 = arith.constant 8 : i32
      %17 = arith.muli %arg0, %c8_i32 : i32
      %18 = tpu.iota {dimensions = array<i32: 0>} : vector<8x1xi32>
      %19 = vector.broadcast %17 : i32 to vector<8x1xi32>
      %20 = arith.addi %19, %18 : vector<8x1xi32>
      %c2_i32 = arith.constant 2 : i32
      %21 = vector.broadcast %c2_i32 : i32 to vector<8x1xi32>
      %22 = arith.cmpi slt, %20, %21 : vector<8x1xi32>
      %cst = arith.constant 0.000000e+00 : f32
      %23 = vector.shape_cast %22 : vector<8x1xi1> to vector<8x1xi1>
      %24 = vector.broadcast %23 : vector<8x1xi1> to vector<8x1024xi1>
      %25 = vector.broadcast %cst : f32 to vector<8x1024xf32>
      %26 = arith.select %24, %16, %25 : vector<8x1024xi1>, vector<8x1024xf32>
      %c0_9 = arith.constant 0 : index
      %c0_10 = arith.constant 0 : index
      %27 = vector.load %arg4[%c0_9, %c0_10] : memref<8x1024xf32, #tpu.memory_space<vmem>>, vector<8x1024xf32>
      %28 = vector.shape_cast %26 : vector<8x1024xf32> to vector<1x8x1024xf32>
      %cst_11 = arith.constant dense<0.000000e+00> : vector<8x1024xf32>
      %29 = vector.multi_reduction <add>, %28, %cst_11 [0] : vector<1x8x1024xf32> to vector<8x1024xf32>
      %30 = arith.addf %27, %29 : vector<8x1024xf32>
      %c0_12 = arith.constant 0 : index
      %c0_13 = arith.constant 0 : index
      %31 = vector.load %arg4[%c0_12, %c0_13] : memref<8x1024xf32, #tpu.memory_space<vmem>>, vector<8x1024xf32>
      tpu.vector_store %arg4[%c0_12, %c0_13], %30 {strides = array<i32>} : memref<8x1024xf32, #tpu.memory_space<vmem>>, vector<8x1024xf32>,
    } else {
    }
    %c0_i32_5 = arith.constant 0 : i32
    %11 = arith.cmpi eq, %arg0, %c0_i32_5 : i32
    %c0_i32_6 = arith.constant 0 : i32
    %12 = arith.cmpi eq, %arg1, %c0_i32_6 : i32
    %13 = arith.andi %11, %12 : i1
    %14 = arith.extui %13 : i1 to i32
    %c0_i32_7 = arith.constant 0 : i32
    %15 = arith.cmpi ne, %14, %c0_i32_7 : i32
    scf.if %15 {
      %c0 = arith.constant 0 : index
      %c0_8 = arith.constant 0 : index
      %16 = vector.load %arg4[%c0, %c0_8] : memref<8x1024xf32, #tpu.memory_space<vmem>>, vector<8x1024xf32>
      %17 = vector.shape_cast %16 : vector<8x1024xf32> to vector<1x8x1024xf32>
      %cst = arith.constant dense<0.000000e+00> : vector<1xf32>
      %18 = vector.multi_reduction <add>, %17, %cst [1, 2] : vector<1x8x1024xf32> to vector<1xf32>
      %19 = vector.shape_cast %18 : vector<1xf32> to vector<1x1x1xf32>
      %20 = vector.extract %19[0, 0, 0] : f32 from vector<1x1x1xf32>
      %cst_9 = arith.constant 4.8828125E-4 : f32
      %21 = arith.mulf %20, %cst_9 : f32
      %22 = vector.broadcast %21 : f32 to vector<8x128xf32>
      %c0_10 = arith.constant 0 : index
      %c0_11 = arith.constant 0 : index
      %23 = vector.load %arg3[%c0_10, %c0_11] : memref<8x128xf32, #tpu.memory_space<vmem>>, vector<8x128xf32>
      tpu.vector_store %arg3[%c0_10, %c0_11], %22 {strides = array<i32>} : memref<8x128xf32, #tpu.memory_space<vmem>>, vector<8x128xf32>,
    } else {
    }
    return
  }
  func.func @transform_0(%arg0: i32, %arg1: i32) -> (i32, i32) {
    %c0_i32 = arith.constant 0 : i32
    return %arg0, %arg1 : i32, i32
  }
  func.func @transform_1(%arg0: i32, %arg1: i32) -> (i32, i32) {
    %c0_i32 = arith.constant 0 : i32
    %c0_i32_0 = arith.constant 0 : i32
    %c0_i32_1 = arith.constant 0 : i32
    return %c0_i32, %c0_i32_0 : i32, i32
  }
}

</mosaic_0001>

<bundles_post_ra>
// kernel: tpu_custom_call.1
= control target key start
LH: loop header
LB: loop body
LE: loop exit
PB: predicated region body
PF: predicated region fallthrough
CT: control target
= control target key end

     0   :  { %6 = vsyncpa [#allocation4], 0  ;;  %s474_s0 = inlined_call_operand.hbm [shape: f32[2,1024], index: 0, kind: input, shape index: {}]   ;;  %s475_s1 = inlined_call_operand.hbm [shape: f32[8,128], index: 1, kind: output, shape index: {}]  }
   0x1   :  { %7 = vsyncpa [#allocation5], 0 }
   0x2   :  { %12 = vsyncadd [#allocation4], 768  ;;  %s427_s6 = smov [#allocation3]   ;;  %s379_s10 = scalar_lea.hbm %s474_s0, 256 }
   0x3   :  { %s13_s7 = sshll.u32 %s427_s6, 4  ;;  %p380_p0 = scmp.ne.s32.totalorder %s474_s0, %s379_s10  ;;  %s14_s7 = int_to_ptr.vmem [resolvable:$true] %s13_s7 }
   0x4   :  { %p383_p1 = scmp.lt.u32.totalorder %s379_s10, %s474_s0 }
   0x6   :  { %p385_p2 = pnand %p383_p1, %p380_p0 }
   0x8   :  { %388 = shalt.err (!%p385_p2)
}
   0x9   :  { %s389_s15 = scalar_lea.vmem %s14_s7, 256  ;;  %s393_s16 = scalar_lea.vmem %s14_s7, 1024 }
   0xa   :  { %p390_p3 = scmp.ne.s32.totalorder %s14_s7, %s389_s15  ;;  %p394_p4 = scmp.lt.s32.totalorder %s14_s7, %s14_s7 }
   0xb   :  { %p395_p5 = scmp.lt.s32.totalorder %s393_s16, %s389_s15 }
   0xd   :  { %p396_p6 = por %p395_p5, %p394_p4 }
   0xf   :  { %p397_p7 = pnand %p396_p6, %p390_p3 }
  0x11   :  { %400 = shalt.err (!%p397_p7)
}
  0x12   :  { %s428_s17 = smov 256   ;;  %s429_s18 = smov 16  }
  0x13   :  { %19 = dma.hbm_to_vmem [thread:$0]  %s474_s0, 256, %s14_s7, [#allocation4], %s428_s17, %s428_s17, %s429_s18  }
  0x14   :  { %423 = dma.done.wait [#allocation4], 1024  }
  0x15   :  { %424 = vsyncadd [#allocation4], 4294966272  ;;  %v181_v0 = vlaneseq  ;;  %v430_v1 = vmov 1983009808   ;;  %v367_v6 = vld [vmem:[#allocation3] ss:$16 sps:$4 sm:$0xff]  }
  0x16   :  { %v201_v2 = vunpack.c.l.s4 %v430_v1  ;;  %v369_v7 = vld [vmem:[#allocation3 + $0x4] ss:$16 sps:$4 sm:$0xff]   ;;  %v370_v8 = vld [vmem:[#allocation3 + $0x20] ss:$16 sps:$4 sm:$0xff]   ;;  %v373_v11 = vld [vmem:[#allocation3 + $0x8] ss:$16 sps:$4 sm:$0xff]  }
  0x17   :  { %v182_v3 = vshrl.u32 %v181_v0, 7  ;;  %v372_v9 = vld [vmem:[#allocation3 + $0x24] ss:$16 sps:$4 sm:$0xff]   ;;  %v376_v12 = vld [vmem:[#allocation3 + $0x28] ss:$16 sps:$4 sm:$0xff]   ;;  %s431_s0 = smov [#allocation6]  }
  0x18   :  { %v202_v4 = vunpack.c.0.s8 %v201_v2  ;;  %v375_v16 = vld [vmem:[#allocation3 + $0xc] ss:$16 sps:$4 sm:$0xff]   ;;  %s351_s21 = sshll.u32 %s431_s0, 4  ;;  %s352_s21 = int_to_ptr.vmem [resolvable:$true] %s351_s21 }
  0x19   :  { %vm185_vm0 = vcmp.lt.s32.totalorder %v182_v3, 2  ;;  %v378_v17 = vld [vmem:[#allocation3 + $0x2c] ss:$16 sps:$4 sm:$0xff]   ;;  %s401_s24 = scalar_lea.vmem %s352_s21, 128  ;;  %p406_p9 = scmp.lt.s32.totalorder %s352_s21, %s352_s21 }
  0x1a   :  { %v205_v5 = vsub.s32 %v202_v4, %v182_v3  ;;  %p402_p8 = scmp.ne.s32.totalorder %s352_s21, %s401_s24  ;;  %p407_p10 = scmp.lt.s32.totalorder %s401_s24, %s401_s24 }
  0x1c   :  { %v206_v10 = vrot.slane %v367_v6, %v205_v5  ;;  %v213_v13 = vrot.slane %v369_v7, %v205_v5  ;;  %v220_v14 = vrot.slane %v370_v8, %v205_v5  ;;  %v227_v15 = vrot.slane %v372_v9, %v205_v5  ;;  %p408_p11 = por %p407_p10, %p406_p9 }
  0x1d   :  { %v242_v18 = vrot.slane %v373_v11, %v205_v5  ;;  %v256_v19 = vrot.slane %v376_v12, %v205_v5  ;;  %v249_v26 = vrot.slane %v375_v16, %v205_v5  ;;  %v263_v27 = vrot.slane %v378_v17, %v205_v5 }
  0x1e   :  { %v228_v20 = vcombine.low %v206_v10, %v220_v14  ;;  %v229_v21 = vcombine.high %v206_v10, %v220_v14  ;;  %v230_v22 = vcombine.low %v213_v13, %v227_v15  ;;  %v231_v23 = vcombine.high %v213_v13, %v227_v15  ;;  %p409_p12 = pnand %p408_p11, %p402_p8 }
  0x1f   :  { %v264_v28 = vcombine.low %v242_v18, %v256_v19  ;;  %v265_v31 = vcombine.high %v242_v18, %v256_v19  ;;  %v266_v34 = vcombine.low %v249_v26, %v263_v27  ;;  %v267_v37 = vcombine.high %v249_v26, %v263_v27 }
  0x20   :  { %v276_v24 = vsel %vm185_vm0, %v228_v20, 0.0  ;;  %v277_v25 = vsel %vm185_vm0, %v229_v21, 0.0  ;;  %v278_v29 = vsel %vm185_vm0, %v230_v22, 0.0  ;;  %v279_v32 = vsel %vm185_vm0, %v231_v23, 0.0 }
  0x21   :  { %v326_v30 = vadd.f32 %v277_v25, %v276_v24  ;;  %v280_v35 = vsel %vm185_vm0, %v264_v28, 0.0  ;;  %v281_v38 = vsel %vm185_vm0, %v265_v31, 0.0  ;;  %v282_v40 = vsel %vm185_vm0, %v266_v34, 0.0 }
  0x22   :  { %v283_v42 = vsel %vm185_vm0, %v267_v37, 0.0 }
  0x23   :  { %v327_v33 = vadd.f32 %v326_v30, %v278_v29 }
  0x25   :  { %v328_v36 = vadd.f32 %v327_v33, %v279_v32 }
  0x27   :  { %v329_v39 = vadd.f32 %v328_v36, %v280_v35 }
  0x29   :  { %v330_v41 = vadd.f32 %v329_v39, %v281_v38 }
  0x2b   :  { %v331_v43 = vadd.f32 %v330_v41, %v282_v40 }
  0x2d   :  { %v332_v44 = vadd.f32 %v331_v43, %v283_v42 }
  0x2f   :  { %333 = vadd.xlane.f32.xlu0 %v332_v44 }
  0xbc   :  { %v334_v45 = vpop.xlane.xlu0 %333 }
  0xbd   :  { %v335_v46 = vrot.slane %v334_v45, 4 }
  0xbf   :  { %v336_v47 = vadd.f32 %v335_v46, %v334_v45 }
  0xc1   :  { %v337_v48 = vrot.slane %v336_v47, 2 }
  0xc3   :  { %v338_v49 = vadd.f32 %v337_v48, %v336_v47 }
  0xc5   :  { %v339_v50 = vrot.slane %v338_v49, 1 }
  0xc7   :  { %v340_v51 = vadd.f32 %v339_v50, %v338_v49 }
  0xc9   :  { %360 = vpush %v340_v51 }
  0xfa   :  { %s361_s22 = spop %360 }
  0xfb   :  { %s342_s23 = smul.f32 0.00048828125, %s361_s22 }
  0xfd   :  { %v343_v52 = vstv %s342_s23 }
  0xfe   :  { %344 = vst [vmem:[#allocation6] sm:$0xff] %v343_v52 }
  0xff   :  { %412 = shalt.err (!%p409_p12)
}
 0x100   :  { %s413_s27 = scalar_lea.hbm %s475_s1, 128 }
 0x101   :  { %p414_p13 = scmp.ne.s32.totalorder %s475_s1, %s413_s27  ;;  %p417_p0 = scmp.lt.u32.totalorder %s413_s27, %s475_s1 }
 0x103   :  { %p419_p1 = pnand %p417_p0, %p414_p13 }
 0x105   :  { %422 = shalt.err (!%p419_p1)
}
 0x106   :  { %354 = dma.vmem_to_hbm [thread:$0]  %s352_s21, 128, %s475_s1, [#allocation5]  }
 0x107   :  { %425 = dma.done.wait [#allocation5], 128  }
 0x108   :  { %426 = vsyncadd [#allocation5], 4294967168 }
 0x109   :  { %358 = vsyncpa [#allocation4], 1 }
 0x10a   :  { %359 = vsyncpa [#allocation5], 1 }

</bundles_post_ra>
